<compile_context>
chip_gen: v6e
topology: v6e:2x2x1
jax: 0.10.0
libtpu: 0.0.40
codegen_flags: <defaults>
</compile_context>

<pallas_src>
import functools
import math

import jax
import jax.numpy as jnp
from jax.experimental import pallas as pl
from jax.experimental.pallas import tpu as pltpu

HALF = jnp.bfloat16  # TPU stand-in for torch.half


# ------------------------------ small helpers -------------------------------

def _pick(dim, candidates):
    """Largest candidate tile that evenly divides dim, else the full dim."""
    for c in candidates:
        if dim >= c and dim % c == 0:
            return c
    return dim


def _cparams(semantics, vmem_bytes_hint):
    """CompilerParams with an honest VMEM budget (~1.5x residency + margin)."""
    try:
        cap = int(pltpu.get_tpu_info().vmem_capacity_bytes) * 3 // 4
    except Exception:
        cap = 48 * 1024 * 1024  # safe on v7x (64 MiB physical per TC)
    limit = int(min(max(int(vmem_bytes_hint) * 3 // 2 + (4 << 20), 16 << 20), cap))
    return pltpu.CompilerParams(dimension_semantics=semantics,
                                vmem_limit_bytes=limit)


# ------------------------------ tiled GEMM kernel ----------------------------

def _mm_kernel(*refs, nk, activation, act_in, has_res):
    if has_res:
        a_ref, w_ref, b_ref, r_ref, o_ref, acc_ref = refs
    else:
        a_ref, w_ref, b_ref, o_ref, acc_ref = refs
        r_ref = None
    k = pl.program_id(2)

    @pl.when(k == 0)
    def _():
        acc_ref[...] = jnp.zeros_like(acc_ref)

    a = a_ref[...]
    if act_in == "silu":                       # fused SiLU on the GEMM input
        af = a.astype(jnp.float32)
        a = (af * jax.nn.sigmoid(af)).astype(a.dtype)
    acc_ref[...] += jnp.dot(a, w_ref[...], preferred_element_type=jnp.float32)

    @pl.when(k == nk - 1)
    def _():
        y = acc_ref[...] + b_ref[...].astype(jnp.float32)
        if has_res:
            y = y + r_ref[...].astype(jnp.float32)
        if activation == "silu":
            y = y * jax.nn.sigmoid(y)
        o_ref[...] = y.astype(o_ref.dtype)


def matmul_bias(a, w, bias, activation=None, act_in=None, residual=None,
                out_dtype=HALF):
    """(M,K)@(K,N)+bias, tiled over (M,N,K), f32 accumulate, fused epilogue."""
    M, K = a.shape
    K2, N = w.shape
    assert K == K2
    tm = _pick(M, (512, 256, 128))
    # Keep tk as large as possible (v5e has one vstore slot -> amortize the f32
    # accumulator read-modify-write over more MXU cycles).
    tk = _pick(K, (1024, 512, 256))
    if act_in is not None and N <= 2048:
        # single N tile => the fused input-SiLU is applied exactly once per A tile
        tn = N
    else:
        tn = _pick(N, (512, 256, 128))
    nk = K // tk
    has_res = residual is not None

    b2 = bias.reshape(1, N).astype(HALF)
    in_specs = [pl.BlockSpec((tm, tk), lambda i, j, k: (i, k)),
                pl.BlockSpec((tk, tn), lambda i, j, k: (k, j)),
                pl.BlockSpec((1, tn), lambda i, j, k: (0, j))]
    inputs = [a.astype(HALF), w.astype(HALF), b2]
    if has_res:
        in_specs.append(pl.BlockSpec((tm, tn), lambda i, j, k: (i, j)))
        inputs.append(residual.astype(HALF))

    hint = (2 * tm * tk * 2 + 2 * tk * tn * 2 + 2 * tn * 2
            + 2 * tm * tn * 2 + tm * tn * 4)
    if has_res:
        hint += 2 * tm * tn * 2

    return pl.pallas_call(
        functools.partial(_mm_kernel, nk=nk, activation=activation,
                          act_in=act_in, has_res=has_res),
        out_shape=jax.ShapeDtypeStruct((M, N), out_dtype),
        grid=(M // tm, N // tn, nk),
        in_specs=in_specs,
        out_specs=pl.BlockSpec((tm, tn), lambda i, j, k: (i, j)),
        scratch_shapes=[pltpu.VMEM((tm, tn), jnp.float32)],
        compiler_params=_cparams(("parallel", "parallel", "arbitrary"), hint),
    )(*inputs)


# --------------- two-input GEMM (skip 1x1 projection, no concat) -------------

def _mm_cat_kernel(*refs, has_aadd, has_badd, a_const, b_const):
    pos = 0
    a_ref = refs[pos]; pos += 1
    aadd_ref = None
    if has_aadd:
        aadd_ref = refs[pos]; pos += 1
    b_ref = refs[pos]; pos += 1
    badd_ref = None
    if has_badd:
        badd_ref = refs[pos]; pos += 1
    w_ref, bias_ref, o_ref = refs[pos], refs[pos + 1], refs[pos + 2]

    xa = a_ref[...].astype(jnp.float32)
    if has_aadd:
        xa = xa + aadd_ref[...].astype(jnp.float32)
    if a_const != 0.0:
        xa = xa + a_const
    xb = b_ref[...].astype(jnp.float32)
    if has_badd:
        xb = xb + badd_ref[...].astype(jnp.float32)
    if b_const != 0.0:
        xb = xb + b_const
    x = jnp.concatenate([xa, xb], axis=-1).astype(HALF)   # concat in VMEM only
    y = jnp.dot(x, w_ref[...], preferred_element_type=jnp.float32)
    y = y + bias_ref[...].astype(jnp.float32)
    o_ref[...] = y.astype(o_ref.dtype)


def linear_cat(a, b, w, bias, a_add=None, a_const=0.0, b_add=None, b_const=0.0,
               out_dtype=HALF):
    """[A ; B] @ W + bias with optional fused per-part adds, no HBM concat."""
    Ba, Ha, Wa_, Ca = a.shape
    Cb = b.shape[-1]
    M = Ba * Ha * Wa_
    K = Ca + Cb
    N = w.shape[-1]
    assert w.shape[0] == K
    a2 = a.reshape(M, Ca).astype(HALF)
    b2 = b.reshape(M, Cb).astype(HALF)
    tm = _pick(M, (512, 256, 128))
    tn = _pick(N, (512, 256, 128))

    in_specs = [pl.BlockSpec((tm, Ca), lambda i, j: (i, 0))]
    inputs = [a2]
    if a_add is not None:
        in_specs.append(pl.BlockSpec((tm, Ca), lambda i, j: (i, 0)))
        inputs.append(a_add.reshape(M, Ca).astype(HALF))
    in_specs.append(pl.BlockSpec((tm, Cb), lambda i, j: (i, 0)))
    inputs.append(b2)
    if b_add is not None:
        in_specs.append(pl.BlockSpec((tm, Cb), lambda i, j: (i, 0)))
        inputs.append(b_add.reshape(M, Cb).astype(HALF))
    in_specs += [pl.BlockSpec((K, tn), lambda i, j: (0, j)),
                 pl.BlockSpec((1, tn), lambda i, j: (0, j))]
    inputs += [w.astype(HALF), bias.reshape(1, N).astype(HALF)]

    hint = (4 * tm * K * 2 + 2 * K * tn * 2 + 2 * tn * 2
            + 2 * tm * tn * 2 + tm * K * 6 + tm * tn * 4)

    out = pl.pallas_call(
        functools.partial(_mm_cat_kernel, has_aadd=a_add is not None,
                          has_badd=b_add is not None,
                          a_const=float(a_const), b_const=float(b_const)),
        out_shape=jax.ShapeDtypeStruct((M, N), out_dtype),
        grid=(M // tm, N // tn),
        in_specs=in_specs,
        out_specs=pl.BlockSpec((tm, tn), lambda i, j: (i, j)),
        compiler_params=_cparams(("parallel", "parallel"), hint),
    )(*inputs)
    return out.reshape(Ba, Ha, Wa_, N)


# ----------------- halo-band conv kernel (stride 1, kh x kw) -----------------

def _conv_band_kernel(x_hbm, w_ref, b_ref, *rest, kh, kw, th, Wo, Wp, band, nI,
                      has_emb, has_res, aligned):
    pos = 0
    emb_ref = res_ref = None
    if has_emb:
        emb_ref = rest[pos]; pos += 1
    if has_res:
        res_ref = rest[pos]; pos += 1
    o_ref, xbuf, sem = rest[pos], rest[pos + 1], rest[pos + 2]

    b = pl.program_id(0)
    i = pl.program_id(1)
    j = pl.program_id(2)
    Cin = xbuf.shape[-1]
    tn = o_ref.shape[-1]
    rows = th * Wp

    def band_copy(row_tile, slot):
        r0 = row_tile * rows
        if aligned:
            r0 = pl.multiple_of(r0, 8)
        return pltpu.make_async_copy(x_hbm.at[b, pl.ds(r0, band)],
                                     xbuf.at[slot, pl.ds(0, band)],
                                     sem.at[slot])

    # Double-buffered band DMA: wait for row-tile i, prefetch row-tile i+1
    # while the Cout (j) loop computes tile i.
    @pl.when(j == 0)
    def _():
        @pl.when(i == 0)
        def _():
            band_copy(0, 0).start()
            # zero the scratch tails once per batch: tap reads for the
            # (discarded) pad columns run up to kw-2 rows past the band.
            xbuf[0, pl.ds(band, 8), :] = jnp.zeros((8, Cin), xbuf.dtype)
            xbuf[1, pl.ds(band, 8), :] = jnp.zeros((8, Cin), xbuf.dtype)

        band_copy(i, i & 1).wait()

        @pl.when(i + 1 < nI)
        def _():
            band_copy(i + 1, (i + 1) & 1).start()

    slot = i & 1
    xs = xbuf.at[slot]
    # Concatenate the kh*kw taps along K -> one deep MXU matmul (K=kh*kw*Cin).
    taps = [xs[pl.ds(dh * Wp + dw, rows), :]
            for dh in range(kh) for dw in range(kw)]
    patch = jnp.concatenate(taps, axis=-1)            # (rows, kh*kw*Cin)
    acc = jnp.dot(patch, w_ref[...], preferred_element_type=jnp.float32)

    bias = b_ref[...].astype(jnp.float32)              # (1, tn)
    if has_emb:
        bias = bias + emb_ref[...].astype(jnp.float32)  # per-batch emb bias
    acc = acc + bias

    # Drop the (Wp - Wo) pad columns; small relayout per step (Wp = Wo + kw-1).
    o3 = acc.reshape(th, Wp, tn)[:, :Wo, :]
    if has_res:
        res = res_ref[0].astype(jnp.float32)
        if res.shape[-1] != tn:                         # zero-extend in VMEM
            res = jnp.concatenate(
                [res, jnp.zeros(res.shape[:-1] + (tn - res.shape[-1],),
                                jnp.float32)], axis=-1)
        o3 = o3 + res
    o_ref[0] = o3.astype(o_ref.dtype)


def conv_band(x, w, b, *, kh, kw, pt, pb, pleft, pright,
              channel_bias=None, residual=None):
    """Same-spatial kh x kw conv (NHWC) with a manual double-buffered halo-band
    DMA, deep-K taps, lane-dense (>=128) output channels and fused
    bias / per-batch channel bias / residual epilogue."""
    B, H, W, Cin = x.shape
    Cout = w.shape[-1]
    assert w.shape == (kh, kw, Cin, Cout)
    Ho = H + pt + pb - kh + 1
    Wo = W + pleft + pright - kw + 1
    assert Ho == H and Wo == W, "only same-spatial convs are used here"
    Wp = W + pleft + pright
    Cpad = 128 if Cout < 128 else Cout        # lane-dense stores for small Cout
    th = _pick(Ho, (16, 8))
    nI = Ho // th
    tn = _pick(Cpad, (256, 128))
    nJ = Cpad // tn
    band = (th + kh - 1) * Wp
    aligned = (th * Wp) % 8 == 0

    xpad = jnp.pad(x.astype(HALF), ((0, 0), (pt, pb), (pleft, pright), (0, 0)))
    xflat = xpad.reshape(B, (H + pt + pb) * Wp, Cin)

    wk = w.reshape(kh * kw * Cin, Cout).astype(HALF)
    b2 = b.reshape(1, Cout).astype(HALF)
    if Cpad != Cout:
        wk = jnp.pad(wk, ((0, 0), (0, Cpad - Cout)))
        b2 = jnp.pad(b2, ((0, 0), (0, Cpad - Cout)))

    has_emb = channel_bias is not None
    has_res = residual is not None

    in_specs = [pl.BlockSpec(memory_space=pl.ANY),
                pl.BlockSpec((kh * kw * Cin, tn), lambda b_, i, j: (0, j)),
                pl.BlockSpec((1, tn), lambda b_, i, j: (0, j))]
    inputs = [xflat, wk, b2]
    if has_emb:
        cb = channel_bias.astype(HALF)
        if Cpad != Cout:
            cb = jnp.pad(cb, ((0, 0), (0, Cpad - Cout)))
        in_specs.append(pl.BlockSpec((1, tn), lambda b_, i, j: (b_, j)))
        inputs.append(cb)
    if has_res:
        if Cpad == Cout:
            in_specs.append(pl.BlockSpec((1, th, Wo, tn),
                                         lambda b_, i, j: (b_, i, 0, j)))
        else:
            # residual kept at its true channel count; zero-extended in VMEM
            in_specs.append(pl.BlockSpec((1, th, Wo, Cout),
                                         lambda b_, i, j: (b_, i, 0, 0)))
        inputs.append(residual.astype(HALF))

    hint = (2 * kh * kw * Cin * tn * 2 + 4 * tn * 2
            + (2 * th * Wo * Cout * 2 if has_res else 0)
            + 2 * th * Wo * tn * 2
            + 2 * (band + 8) * Cin * 2
            + th * Wp * kh * kw * Cin * 2
            + th * Wp * tn * 4 + th * Wo * tn * 4)

    out = pl.pallas_call(
        functools.partial(_conv_band_kernel, kh=kh, kw=kw, th=th, Wo=Wo, Wp=Wp,
                          band=band, nI=nI, has_emb=has_emb, has_res=has_res,
                          aligned=aligned),
        out_shape=jax.ShapeDtypeStruct((B, Ho, Wo, Cpad), HALF),
        grid=(B, nI, nJ),
        in_specs=in_specs,
        out_specs=pl.BlockSpec((1, th, Wo, tn), lambda b_, i, j: (b_, i, 0, j)),
        scratch_shapes=[pltpu.VMEM((2, band + 8, Cin), HALF),
                        pltpu.SemaphoreType.DMA((2,))],
        # B is 'parallel' (v7x megacore when B>=2); i/j stay 'arbitrary' since
        # the band double-buffer carries state across row tiles within a batch.
        compiler_params=_cparams(("parallel", "arbitrary", "arbitrary"), hint),
    )(*inputs)
    if Cpad != Cout:
        out = out[..., :Cout]
    return out


def conv3x3(x, w, b, channel_bias=None, residual=None):
    return conv_band(x, w, b, kh=3, kw=3, pt=1, pb=1, pleft=1, pright=1,
                     channel_bias=channel_bias, residual=residual)


def conv3x3_stride2(x, w, b):
    """3x3/stride-2 conv as one XLA space-to-depth repack + a 2x2 stride-1
    halo-band conv with 4*Cin-deep taps (no HBM im2col round trip)."""
    B, H, W, Cin = x.shape
    Cout = w.shape[-1]
    assert H % 2 == 0 and W % 2 == 0
    Ho, Wo = H // 2, W // 2
    xs = x.reshape(B, Ho, 2, Wo, 2, Cin).transpose(0, 1, 3, 2, 4, 5)
    xs = xs.reshape(B, Ho, Wo, 4 * Cin).astype(HALF)
    # remap the 3x3 stride-2 taps onto a 2x2 kernel over (ph, pw, cin) channels
    w4 = jnp.zeros((2, 2, 2, 2, Cin, Cout), HALF)
    phase = {0: (0, 1), 1: (1, 0), 2: (1, 1)}
    for dh in range(3):
        for dw in range(3):
            kbh, ph = phase[dh]
            kbw, pw = phase[dw]
            w4 = w4.at[kbh, kbw, ph, pw].set(w[dh, dw].astype(HALF))
    w4 = w4.reshape(2, 2, 4 * Cin, Cout)
    return conv_band(xs, w4, b, kh=2, kw=2, pt=1, pb=0, pleft=1, pright=0)


def conv1x1(x, w, b):
    B, H, W, Cin = x.shape
    y = matmul_bias(x.reshape(B * H * W, Cin), w, b)
    return y.reshape(B, H, W, -1)


# ---------------- fused, HW-tiled GroupNorm (+adds, +cat, +SiLU) -------------

def _group_onehot(offset, c_local, c_total, groups):
    gsize = c_total // groups
    gid = (offset + jnp.arange(c_local)) // gsize
    return (gid[:, None] == jnp.arange(groups)[None, :]).astype(jnp.float32)


def _gn_stats_kernel(*refs, n_in, has_add, add_const):
    pos = 0
    xs = []
    for idx in range(n_in):
        x = refs[pos][0].astype(jnp.float32); pos += 1
        if has_add[idx]:
            x = x + refs[pos][0].astype(jnp.float32); pos += 1
        if add_const[idx] != 0.0:
            x = x + add_const[idx]
        xs.append(x)
    ohs = refs[pos:pos + n_in]
    o_ref = refs[pos + n_in]

    @pl.when(pl.program_id(1) == 0)
    def _():
        o_ref[...] = jnp.zeros_like(o_ref)

    gs1 = None
    gs2 = None
    for idx in range(n_in):
        x = xs[idx]
        oh = ohs[idx][...]
        s1 = jnp.sum(x, axis=0, keepdims=True)            # (1, Ci)
        s2 = jnp.sum(x * x, axis=0, keepdims=True)
        g1 = jnp.dot(s1, oh, preferred_element_type=jnp.float32)   # (1, G)
        g2 = jnp.dot(s2, oh, preferred_element_type=jnp.float32)
        gs1 = g1 if gs1 is None else gs1 + g1
        gs2 = g2 if gs2 is None else gs2 + g2
    o_ref[0] += jnp.concatenate([gs1, gs2], axis=0)        # (2, G)


def _gn_apply_kernel(*refs, n_in, has_add, add_const, activation, csplits):
    pos = 0
    xs = []
    for idx in range(n_in):
        x = refs[pos][0].astype(jnp.float32); pos += 1
        if has_add[idx]:
            x = x + refs[pos][0].astype(jnp.float32); pos += 1
        if add_const[idx] != 0.0:
            x = x + add_const[idx]
        xs.append(x)
    scale_ref, shift_ref, o_ref = refs[pos], refs[pos + 1], refs[pos + 2]
    scale = scale_ref[...]            # (1, Ctot) f32
    shift = shift_ref[...]
    ys = []
    for idx, (c0, c1) in enumerate(csplits):
        y = xs[idx] * scale[:, c0:c1] + shift[:, c0:c1]
        if activation == "silu":
            y = y * jax.nn.sigmoid(y)
        ys.append(y)
    out = ys[0] if n_in == 1 else jnp.concatenate(ys, axis=-1)
    o_ref[0] = out.astype(o_ref.dtype)


def _groupnorm_multi(xs, adds, consts, gamma, beta, groups, eps, activation):
    """HW-tiled GroupNorm over the channel-concat of `xs` (each (B,H,W,Ci));
    optional per-part pre-normalization adds are fused into both passes and the
    concatenated normalized output is written directly (no HBM concat)."""
    B, H, W = xs[0].shape[:3]
    HW = H * W
    cs = [x.shape[-1] for x in xs]
    Ct = sum(cs)
    assert Ct % groups == 0
    thw = _pick(HW, (2048, 1024, 512, 256))
    nT = HW // thw
    n_in = len(xs)
    has_add = tuple(a is not None for a in adds)
    consts = tuple(float(c) for c in consts)

    xs3 = [x.reshape(B, HW, c).astype(HALF) for x, c in zip(xs, cs)]
    adds3 = [None if a is None else a.reshape(B, HW, c).astype(HALF)
             for a, c in zip(adds, cs)]
    offs = [sum(cs[:i]) for i in range(n_in)]
    ohs = [_group_onehot(offs[i], cs[i], Ct, groups) for i in range(n_in)]

    # ---- pass 1: per-(batch, group) sum / sum-of-squares ----
    in_specs = []
    inputs = []
    for idx in range(n_in):
        ci = cs[idx]
        in_specs.append(pl.BlockSpec((1, thw, ci), lambda b, t: (b, t, 0)))
        inputs.append(xs3[idx])
        if has_add[idx]:
            in_specs.append(pl.BlockSpec((1, thw, ci), lambda b, t: (b, t, 0)))
            inputs.append(adds3[idx])
    for oh in ohs:
        in_specs.append(pl.BlockSpec(oh.shape, lambda b, t: (0, 0)))
        inputs.append(oh)
    hint = sum(4 * thw * c * 2 for c in cs) + thw * Ct * 4 + Ct * groups * 4
    stats = pl.pallas_call(
        functools.partial(_gn_stats_kernel, n_in=n_in, has_add=has_add,
                          add_const=consts),
        out_shape=jax.ShapeDtypeStruct((B, 2, groups), jnp.float32),
        grid=(B, nT),
        in_specs=in_specs,
        out_specs=pl.BlockSpec((1, 2, groups), lambda b, t: (b, 0, 0)),
        compiler_params=_cparams(("parallel", "arbitrary"), hint),
    )(*inputs)

    # tiny per-(batch, channel) affine coefficients (plain XLA, (B, Ct) only)
    # NOTE: E[x^2]-E[x]^2 in f32; slightly less accurate than a two-pass mean.
    n = HW * (Ct // groups)
    mean = stats[:, 0, :] / n
    var = stats[:, 1, :] / n - mean * mean
    rstd = jax.lax.rsqrt(jnp.maximum(var, 0.0) + eps)
    gid = jnp.arange(Ct) // (Ct // groups)
    g32 = gamma.astype(jnp.float32)[None, :]
    b32 = beta.astype(jnp.float32)[None, :]
    scale = rstd[:, gid] * g32
    shift = b32 - mean[:, gid] * scale

    # ---- pass 2: normalize (+affine, +SiLU), emit channel-concat output ----
    in_specs2 = []
    inputs2 = []
    for idx in range(n_in):
        ci = cs[idx]
        in_specs2.append(pl.BlockSpec((1, thw, ci), lambda b, t: (b, t, 0)))
        inputs2.append(xs3[idx])
        if has_add[idx]:
            in_specs2.append(pl.BlockSpec((1, thw, ci), lambda b, t: (b, t, 0)))
            inputs2.append(adds3[idx])
    in_specs2 += [pl.BlockSpec((1, Ct), lambda b, t: (b, 0)),
                  pl.BlockSpec((1, Ct), lambda b, t: (b, 0))]
    inputs2 += [scale, shift]
    csplits = tuple((offs[i], offs[i] + cs[i]) for i in range(n_in))
    hint2 = (sum(4 * thw * c * 2 for c in cs) + 2 * thw * Ct * 2
             + thw * Ct * 8 + 4 * Ct * 4)
    out = pl.pallas_call(
        functools.partial(_gn_apply_kernel, n_in=n_in, has_add=has_add,
                          add_const=consts, activation=activation,
                          csplits=csplits),
        out_shape=jax.ShapeDtypeStruct((B, HW, Ct), HALF),
        grid=(B, nT),
        in_specs=in_specs2,
        out_specs=pl.BlockSpec((1, thw, Ct), lambda b, t: (b, t, 0)),
        compiler_params=_cparams(("parallel", "parallel"), hint2),
    )(*inputs2)
    return out.reshape(B, H, W, Ct)


def groupnorm(x, gamma, beta, groups=8, eps=1e-5, activation=None):
    return _groupnorm_multi([x], [None], (0.0,), gamma, beta, groups, eps,
                            activation)


def groupnorm_cat(a, b, gamma, beta, groups=8, eps=1e-5, activation=None,
                  a_add=None, a_const=0.0, b_add=None, b_const=0.0):
    return _groupnorm_multi([a, b], [a_add, b_add], (a_const, b_const),
                            gamma, beta, groups, eps, activation)


# ------------------------------ attention kernel -----------------------------

def _attn_kernel(q_ref, kT_ref, v_ref, o_ref, *, scale, valid_k):
    q = q_ref[0]                                     # (tq, D)
    kT = kT_ref[0]                                   # (D, Tk_pad)
    v = v_ref[0]                                     # (Tk_pad, D)
    s = jnp.dot(q, kT, preferred_element_type=jnp.float32) * scale
    col = jax.lax.broadcasted_iota(jnp.int32, s.shape, 1)
    s = jnp.where(col < valid_k, s, -1e30)           # mask padded keys
    m = jnp.max(s, axis=-1, keepdims=True)
    p = jnp.exp(s - m)
    denom = jnp.sum(p, axis=-1, keepdims=True)
    p = p * pl.reciprocal(denom, approx=True)        # EUP, off the VPU path
    o = jnp.dot(p.astype(v.dtype), v, preferred_element_type=jnp.float32)
    o_ref[0] = o.astype(o_ref.dtype)


def cross_attention(q, k, v):
    """Cross-attention: Q tiled over the grid, K passed pre-transposed and
    Tk zero-padded to a lane-dense 128 multiple with a -inf score mask."""
    B, Tq, D = q.shape
    _, Tk, _ = k.shape
    Tk_pad = max(128, ((Tk + 127) // 128) * 128)
    kT = jnp.transpose(k, (0, 2, 1)).astype(HALF)    # (B, D, Tk)
    vp = v.astype(HALF)
    if Tk_pad != Tk:
        kT = jnp.pad(kT, ((0, 0), (0, 0), (0, Tk_pad - Tk)))
        vp = jnp.pad(vp, ((0, 0), (0, Tk_pad - Tk), (0, 0)))
    tq = _pick(Tq, (512, 256, 128))
    scale = 1.0 / math.sqrt(D)
    hint = (2 * tq * D * 2 + 2 * D * Tk_pad * 2 + 2 * Tk_pad * D * 2
            + 2 * tq * D * 2 + 2 * tq * Tk_pad * 4)
    return pl.pallas_call(
        functools.partial(_attn_kernel, scale=scale, valid_k=Tk),
        out_shape=jax.ShapeDtypeStruct((B, Tq, D), HALF),
        grid=(B, Tq // tq),
        in_specs=[pl.BlockSpec((1, tq, D), lambda b, i: (b, i, 0)),
                  pl.BlockSpec((1, D, Tk_pad), lambda b, i: (b, 0, 0)),
                  pl.BlockSpec((1, Tk_pad, D), lambda b, i: (b, 0, 0))],
        out_specs=pl.BlockSpec((1, tq, D), lambda b, i: (b, i, 0)),
        compiler_params=_cparams(("parallel", "parallel"), hint),
    )(q.astype(HALF), kT, vp)


# ------------------------------ elementwise adds -----------------------------

def _add_kernel(a_ref, b_ref, o_ref):
    o_ref[...] = (a_ref[...].astype(jnp.float32)
                  + b_ref[...].astype(jnp.float32)).astype(o_ref.dtype)


def _scalar_add_kernel(a_ref, o_ref, *, const):
    o_ref[...] = (a_ref[...].astype(jnp.float32) + const).astype(o_ref.dtype)


def _lane_dense_2d(n, fallback_lanes):
    for lanes in (1024, 512, 256, 128):
        if n % lanes == 0:
            return n // lanes, lanes
    return n // fallback_lanes, fallback_lanes


def pallas_add(a, b):
    assert a.shape == b.shape
    M, C = _lane_dense_2d(a.size, a.shape[-1])       # lane-dense flatten
    a2 = a.reshape(M, C)
    b2 = b.reshape(M, C).astype(a.dtype)
    tm = _pick(M, (1024, 512, 256, 128, 64, 32, 16, 8))
    out = pl.pallas_call(
        _add_kernel,
        out_shape=jax.ShapeDtypeStruct((M, C), a.dtype),
        grid=(M // tm,),
        in_specs=[pl.BlockSpec((tm, C), lambda i: (i, 0)),
                  pl.BlockSpec((tm, C), lambda i: (i, 0))],
        out_specs=pl.BlockSpec((tm, C), lambda i: (i, 0)),
        compiler_params=_cparams(("parallel",), 6 * tm * C * 2 + 2 * tm * C * 4),
    )(a2, b2)
    return out.reshape(a.shape)


def pallas_add_scalar(a, const):
    M, C = _lane_dense_2d(a.size, a.shape[-1])
    a2 = a.reshape(M, C)
    tm = _pick(M, (1024, 512, 256, 128, 64, 32, 16, 8))
    out = pl.pallas_call(
        functools.partial(_scalar_add_kernel, const=float(const)),
        out_shape=jax.ShapeDtypeStruct((M, C), a.dtype),
        grid=(M // tm,),
        in_specs=[pl.BlockSpec((tm, C), lambda i: (i, 0))],
        out_specs=pl.BlockSpec((tm, C), lambda i: (i, 0)),
        compiler_params=_cparams(("parallel",), 4 * tm * C * 2 + tm * C * 4),
    )(a2)
    return out.reshape(a.shape)


# ------------------------- blocks built from the kernels ---------------------

def resblock(h, emb, p, groups=8):
    x_in = h
    hh = groupnorm(h, p["gn1_g"], p["gn1_b"], groups, activation="silu")
    emb_out = matmul_bias(emb, p["emb_w"], p["emb_b"], act_in="silu")
    hh = conv3x3(hh, p["conv1_w"], p["conv1_b"], channel_bias=emb_out)
    hh = groupnorm(hh, p["gn2_g"], p["gn2_b"], groups, activation="silu")
    if "skip_w" in p:
        x_in = conv1x1(x_in, p["skip_w"], p["skip_b"])
    return conv3x3(hh, p["conv2_w"], p["conv2_b"], residual=x_in)


def resblock_cat(a, b, emb, p, groups=8, a_add=None, a_const=0.0,
                 b_add=None, b_const=0.0):
    """Output-block ResBlock on the channel-concat of a and b (plus fused
    ControlNet injections) without materializing the concatenation in HBM."""
    assert "skip_w" in p
    hh = groupnorm_cat(a, b, p["gn1_g"], p["gn1_b"], groups, activation="silu",
                       a_add=a_add, a_const=a_const,
                       b_add=b_add, b_const=b_const)
    emb_out = matmul_bias(emb, p["emb_w"], p["emb_b"], act_in="silu")
    hh = conv3x3(hh, p["conv1_w"], p["conv1_b"], channel_bias=emb_out)
    hh = groupnorm(hh, p["gn2_g"], p["gn2_b"], groups, activation="silu")
    x_in = linear_cat(a, b, p["skip_w"], p["skip_b"], a_add=a_add,
                      a_const=a_const, b_add=b_add, b_const=b_const)
    return conv3x3(hh, p["conv2_w"], p["conv2_b"], residual=x_in)


def cross_attn_block(x, context, p, groups=8):
    B, H, W, C = x.shape
    _, T, Cc = context.shape
    h = groupnorm(x, p["gn_g"], p["gn_b"], groups, activation=None)
    q = matmul_bias(h.reshape(B * H * W, C), p["wq"], p["bq"]).reshape(B, H * W, C)
    ctx2 = context.reshape(B * T, Cc)
    k = matmul_bias(ctx2, p["wk"], p["bk"]).reshape(B, T, C)
    v = matmul_bias(ctx2, p["wv"], p["bv"]).reshape(B, T, C)
    a = cross_attention(q, k, v)
    o = matmul_bias(a.reshape(B * H * W, C), p["wo"], p["bo"],
                    residual=x.reshape(B * H * W, C))
    return o.reshape(B, H, W, C)


def upsample(x, p):
    # TODO(synk): fuse nearest-2x replication into the conv band DMA (4-phase
    # decomposition) instead of materializing the upsampled tensor in HBM.
    x = jnp.repeat(jnp.repeat(x, 2, axis=1), 2, axis=2)
    return conv3x3(x, p["w"], p["b"])


# ----------------------------- forward-glue helpers --------------------------

def timestep_embedding(timesteps, dim, max_period=10000):
    half = dim // 2
    freqs = jnp.exp(-math.log(max_period)
                    * jnp.arange(half, dtype=jnp.float32) / half)
    args = timesteps.astype(jnp.float32)[:, None] * freqs[None, :]
    return jnp.concatenate([jnp.cos(args), jnp.sin(args)], axis=-1)


def prepare_injection(base, x, require_channel_alignment):
    """Normalize a ControlNet/T2I injection (NHWC) into a fused-add tensor
    matching `base`, or a scalar constant (returned as (tensor|None, const))."""
    if isinstance(x, float):
        return None, x
    x = jnp.asarray(x)
    if require_channel_alignment and x.shape[-1] < base.shape[-1]:
        # TODO(synk): channel pad could be folded into the consuming kernel.
        x = jnp.pad(x, ((0, 0), (0, 0), (0, 0),
                        (0, base.shape[-1] - x.shape[-1])))
    bh, bw = base.shape[1], base.shape[2]
    xh, xw = x.shape[1], x.shape[2]
    if xh == 1 and xw == 1:
        x = jnp.broadcast_to(x, (x.shape[0], bh, bw, x.shape[3]))
    elif bh != xh or bw != xw:
        x = jax.image.resize(x, (x.shape[0], bh, bw, x.shape[3]),
                             method="nearest")
    return x.astype(HALF), 0.0


def aligned_adding(base, x, require_channel_alignment):
    """Standalone (materializing) aligned add; used only where the result must
    live in HBM anyway (input-path T2I injection feeding the skip list)."""
    add, const = prepare_injection(base, x, require_channel_alignment)
    if add is None:
        if const == 0.0:
            return base
        return pallas_add_scalar(base, const)
    return pallas_add(base, add)


def _nchw_to_nhwc(x):
    return jnp.transpose(x, (0, 2, 3, 1))


def _nhwc_to_nchw(x):
    return jnp.transpose(x, (0, 3, 1, 2))


# ------------------------------ parameter init -------------------------------

class _KeyGen:
    def __init__(self, seed):
        self._key = jax.random.PRNGKey(seed)

    def __call__(self):
        self._key, sub = jax.random.split(self._key)
        return sub


def _linear_p(kg, fan_in, fan_out):
    w = jax.random.normal(kg(), (fan_in, fan_out), jnp.float32) / math.sqrt(fan_in)
    return w.astype(HALF), jnp.zeros((fan_out,), HALF)


def _conv3_p(kg, cin, cout):
    w = jax.random.normal(kg(), (3, 3, cin, cout), jnp.float32) / math.sqrt(9 * cin)
    return w.astype(HALF), jnp.zeros((cout,), HALF)


def _gn_p(c):
    return jnp.ones((c,), jnp.float32), jnp.zeros((c,), jnp.float32)


def _resblock_p(kg, cin, cout, emb_dim):
    p = {}
    p["gn1_g"], p["gn1_b"] = _gn_p(cin)
    p["conv1_w"], p["conv1_b"] = _conv3_p(kg, cin, cout)
    p["emb_w"], p["emb_b"] = _linear_p(kg, emb_dim, cout)
    p["gn2_g"], p["gn2_b"] = _gn_p(cout)
    p["conv2_w"], p["conv2_b"] = _conv3_p(kg, cout, cout)
    if cin != cout:
        p["skip_w"], p["skip_b"] = _linear_p(kg, cin, cout)
    return p


def _attn_p(kg, c, ctx_dim):
    p = {}
    p["gn_g"], p["gn_b"] = _gn_p(c)
    p["wq"], p["bq"] = _linear_p(kg, c, c)
    p["wk"], p["bk"] = _linear_p(kg, ctx_dim, c)
    p["wv"], p["bv"] = _linear_p(kg, ctx_dim, c)
    p["wo"], p["bo"] = _linear_p(kg, c, c)
    return p


# -------------------------------- the model ----------------------------------

class OnediffControlNetModelPallas:
    """Pallas re-implementation of OnediffControlNetModel.forward for a small
    synthetic UNet (deterministic weights; weights stored bf16 = convert_to_fp16)."""

    def __init__(self, seed=0, in_channels=4, model_channels=32, out_channels=4,
                 context_dim=32, groups=8):
        kg = _KeyGen(seed)
        C = model_channels
        emb_dim = 4 * C
        self.model_channels = C
        self.groups = groups
        self.label_emb = None  # TODO(synk): SDXL label_emb path not exercised.

        w1, b1 = _linear_p(kg, C, emb_dim)
        w2, b2 = _linear_p(kg, emb_dim, emb_dim)
        self.time_embed = {"w1": w1, "b1": b1, "w2": w2, "b2": b2}

        ci_w, ci_b = _conv3_p(kg, in_channels, C)
        dn_w, dn_b = _conv3_p(kg, C, C)
        self.input_blocks = [
            {"type": "conv_in", "w": ci_w, "b": ci_b},
            {"type": "res", "res": _resblock_p(kg, C, C, emb_dim)},
            {"type": "res_attn", "res": _resblock_p(kg, C, C, emb_dim),
             "attn": _attn_p(kg, C, context_dim)},
            {"type": "down", "w": dn_w, "b": dn_b},
        ]

        self.middle_block = {
            "res1": _resblock_p(kg, C, C, emb_dim),
            "attn": _attn_p(kg, C, context_dim),
            "res2": _resblock_p(kg, C, C, emb_dim),
        }

        up_w, up_b = _conv3_p(kg, C, C)
        self.output_blocks = [
            {"type": "res_up", "res": _resblock_p(kg, 2 * C, C, emb_dim),
             "up": {"w": up_w, "b": up_b}},
            {"type": "res", "res": _resblock_p(kg, 2 * C, C, emb_dim)},
            {"type": "res_attn", "res": _resblock_p(kg, 2 * C, C, emb_dim),
             "attn": _attn_p(kg, C, context_dim)},
            {"type": "res", "res": _resblock_p(kg, 2 * C, C, emb_dim)},
        ]

        og, ob = _gn_p(C)
        ow, obias = _conv3_p(kg, C, out_channels)
        self.out_head = {"gn_g": og, "gn_b": ob, "w": ow, "b": obias}

    # --- sub-module runners ---
    def _time_embed(self, t_emb):
        te = self.time_embed
        h = matmul_bias(t_emb, te["w1"], te["b1"], activation="silu")
        return matmul_bias(h, te["w2"], te["b2"])

    def _run_input_block(self, i, h, emb, context):
        blk = self.input_blocks[i]
        t = blk["type"]
        if t == "conv_in":
            return conv3x3(h, blk["w"], blk["b"])
        if t == "res":
            return resblock(h, emb, blk["res"], self.groups)
        if t == "res_attn":
            h = resblock(h, emb, blk["res"], self.groups)
            return cross_attn_block(h, context, blk["attn"], self.groups)
        if t == "down":
            return conv3x3_stride2(h, blk["w"], blk["b"])
        raise ValueError(t)

    def _run_middle(self, h, emb, context):
        m = self.middle_block
        h = resblock(h, emb, m["res1"], self.groups)
        h = cross_attn_block(h, context, m["attn"], self.groups)
        return resblock(h, emb, m["res2"], self.groups)

    def _run_output_block(self, i, h, skip, emb, context,
                          a_add, a_const, b_add, b_const):
        blk = self.output_blocks[i]
        h = resblock_cat(h, skip, emb, blk["res"], self.groups,
                         a_add=a_add, a_const=a_const,
                         b_add=b_add, b_const=b_const)
        if blk["type"] == "res_attn":
            h = cross_attn_block(h, context, blk["attn"], self.groups)
        if blk["type"] == "res_up":
            h = upsample(h, blk["up"])
        return h

    def _run_out(self, h):
        p = self.out_head
        h = groupnorm(h, p["gn_g"], p["gn_b"], self.groups, activation="silu")
        return conv3x3(h, p["w"], p["b"])

    # --- forward: mirrors OnediffControlNetModel.forward ---
    def forward(self, x, timesteps, context, y, total_t2i_adapter_embedding,
                total_controlnet_embedding, is_sdxl, require_inpaint_hijack):
        x = x.astype(HALF)
        context = context.astype(HALF)
        if y is not None:
            y = y.astype(HALF)

        # embeddings arrive NCHW (PyTorch convention) -> internal NHWC lists
        t2i = [e if isinstance(e, float) else _nchw_to_nhwc(jnp.asarray(e))
               for e in total_t2i_adapter_embedding]
        ctrl = [e if isinstance(e, float) else _nchw_to_nhwc(jnp.asarray(e))
                for e in total_controlnet_embedding]

        hs = []
        t_emb = timestep_embedding(timesteps, self.model_channels).astype(HALF)
        emb = self._time_embed(t_emb).astype(HALF)
        if is_sdxl:
            # TODO(synk): label_emb(y) addition not implemented (not exercised).
            pass

        h = _nchw_to_nhwc(x)
        for i in range(len(self.input_blocks)):
            self.current_h_shape = (h.shape[0], h.shape[3], h.shape[1], h.shape[2])
            h = self._run_input_block(i, h, emb, context)
            t2i_injection = [3, 5, 8] if is_sdxl else [2, 5, 8, 11]
            if i in t2i_injection and len(t2i) > 0:
                # stored in hs AND consumed downstream -> must materialize;
                # the add kernel runs on a lane-dense flattened layout.
                h = aligned_adding(h, t2i.pop(0), require_inpaint_hijack)
            hs.append(h)

        self.current_h_shape = (h.shape[0], h.shape[3], h.shape[1], h.shape[2])
        h = self._run_middle(h, emb, context)

        # ControlNet middle injection is not a standalone pass: it is fused as
        # a pre-GroupNorm add into the first output block (and its skip proj).
        a_add, a_const = prepare_injection(h, ctrl.pop(), require_inpaint_hijack)
        if len(t2i) > 0 and is_sdxl:
            h = aligned_adding(h, t2i.pop(0), require_inpaint_hijack)

        for i in range(len(self.output_blocks)):
            self.current_h_shape = (h.shape[0], h.shape[3], h.shape[1], h.shape[2])
            skip = hs.pop()
            b_add, b_const = prepare_injection(skip, ctrl.pop(),
                                               require_inpaint_hijack)
            h = self._run_output_block(i, h, skip, emb, context,
                                       a_add, a_const, b_add, b_const)
            a_add, a_const = None, 0.0

        h = h.astype(x.dtype)
        h = self._run_out(h)
        return _nhwc_to_nchw(h)                       # back to NCHW


# ------------------------------------ main ------------------------------------

if __name__ == "__main__":
    B, Cin, H, W = 2, 4, 16, 16
    C = 32
    T, ctx_dim = 8, 32

    key = jax.random.PRNGKey(0)
    ks = iter(jax.random.split(key, 16))
    x = jax.random.normal(next(ks), (B, Cin, H, W), jnp.float32)
    timesteps = jnp.array([17.0, 511.0], jnp.float32)
    context = jax.random.normal(next(ks), (B, T, ctx_dim), jnp.float32)

    # ControlNet residuals (NCHW): one per input-block skip + one for the middle block
    ctrl_shapes = [(B, C, 16, 16), (B, C, 16, 16), (B, C, 16, 16),
                   (B, C, 8, 8), (B, C, 8, 8)]
    total_controlnet_embedding = [
        0.1 * jax.random.normal(next(ks), s, jnp.float32) for s in ctrl_shapes]
    # one T2I-adapter residual, injected after input block index 2 (non-SDXL path)
    total_t2i_adapter_embedding = [
        0.1 * jax.random.normal(next(ks), (B, C, 16, 16), jnp.float32)]

    model = OnediffControlNetModelPallas(seed=0, in_channels=Cin, model_channels=C,
                                         out_channels=Cin, context_dim=ctx_dim)
    out = model.forward(x, timesteps, context, None,
                        total_t2i_adapter_embedding, total_controlnet_embedding,
                        is_sdxl=False, require_inpaint_hijack=False)
    out = jax.block_until_ready(out)

    assert out.shape == (B, Cin, H, W), out.shape
    assert out.dtype == HALF, out.dtype
    assert bool(jnp.all(jnp.isfinite(out.astype(jnp.float32))))
    print("KERNEL_OK")
</pallas_src>

<mosaic_0001>
module attributes {stable_mosaic.version = 11 : i64} {
  func.func @_mm_kernel(%arg0: i32, %arg1: i32, %arg2: i32, %arg3: memref<2x32xbf16, #tpu.memory_space<vmem>>, %arg4: memref<32x128xbf16, #tpu.memory_space<vmem>>, %arg5: memref<1x128xbf16, #tpu.memory_space<vmem>>, %arg6: memref<2x128xbf16, #tpu.memory_space<vmem>>, %arg7: memref<2x128xf32, #tpu.memory_space<vmem>>) attributes {dimension_semantics = [#tpu.dimension_semantics<parallel>, #tpu.dimension_semantics<parallel>, #tpu.dimension_semantics<arbitrary>], iteration_bounds = array<i64: 1, 1, 1>, scalar_prefetch = 0 : i64, scratch_operands = 1 : i64, tpu.core_type = #tpu.core_type<tc>, window_params = [{transform_indices = @transform_0, window_bounds = array<i64: 2, 32>}, {transform_indices = @transform_1, window_bounds = array<i64: 32, 128>}, {transform_indices = @transform_2, window_bounds = array<i64: 1, 128>}, {transform_indices = @transform_3, window_bounds = array<i64: 2, 128>}]} {
    %c0_i32 = arith.constant 0 : i32
    %0 = arith.cmpi eq, %arg2, %c0_i32 : i32
    %1 = arith.extui %0 : i1 to i32
    %c0_i32_0 = arith.constant 0 : i32
    %2 = arith.cmpi ne, %1, %c0_i32_0 : i32
    scf.if %2 {
      %cst_10 = arith.constant 0.000000e+00 : f32
      %12 = vector.broadcast %cst_10 : f32 to vector<2x128xf32>
      %c0_11 = arith.constant 0 : index
      %c0_12 = arith.constant 0 : index
      %13 = vector.load %arg7[%c0_11, %c0_12] : memref<2x128xf32, #tpu.memory_space<vmem>>, vector<2x128xf32>
      tpu.vector_store %arg7[%c0_11, %c0_12], %12 {strides = array<i32>} : memref<2x128xf32, #tpu.memory_space<vmem>>, vector<2x128xf32>,
    } else {
    }
    %c0 = arith.constant 0 : index
    %c0_1 = arith.constant 0 : index
    %3 = vector.load %arg3[%c0, %c0_1] : memref<2x32xbf16, #tpu.memory_space<vmem>>, vector<2x32xbf16>
    %c0_2 = arith.constant 0 : index
    %c0_3 = arith.constant 0 : index
    %4 = vector.load %arg7[%c0_2, %c0_3] : memref<2x128xf32, #tpu.memory_space<vmem>>, vector<2x128xf32>
    %c0_4 = arith.constant 0 : index
    %c0_5 = arith.constant 0 : index
    %5 = vector.load %arg4[%c0_4, %c0_5] : memref<32x128xbf16, #tpu.memory_space<vmem>>, vector<32x128xbf16>
    %cst = arith.constant dense<0.000000e+00> : vector<2x128xf32>
    %6 = tpu.matmul %3, %5, %cst {dimension_numbers = #tpu.dot_dimension_numbers<[1], [0], [0], [1], [0, 0, 1, 1], [], []>} : vector<2x32xbf16>, vector<32x128xbf16>, vector<2x128xf32> -> vector<2x128xf32>
    %7 = arith.addf %4, %6 : vector<2x128xf32>
    %c0_6 = arith.constant 0 : index
    %c0_7 = arith.constant 0 : index
    %8 = vector.load %arg7[%c0_6, %c0_7] : memref<2x128xf32, #tpu.memory_space<vmem>>, vector<2x128xf32>
    tpu.vector_store %arg7[%c0_6, %c0_7], %7 {strides = array<i32>} : memref<2x128xf32, #tpu.memory_space<vmem>>, vector<2x128xf32>,
    %c0_i32_8 = arith.constant 0 : i32
    %9 = arith.cmpi eq, %arg2, %c0_i32_8 : i32
    %10 = arith.extui %9 : i1 to i32
    %c0_i32_9 = arith.constant 0 : i32
    %11 = arith.cmpi ne, %10, %c0_i32_9 : i32
    scf.if %11 {
      %c0_10 = arith.constant 0 : index
      %c0_11 = arith.constant 0 : index
      %12 = vector.load %arg7[%c0_10, %c0_11] : memref<2x128xf32, #tpu.memory_space<vmem>>, vector<2x128xf32>
      %c0_12 = arith.constant 0 : index
      %c0_13 = arith.constant 0 : index
      %13 = vector.load %arg5[%c0_12, %c0_13] : memref<1x128xbf16, #tpu.memory_space<vmem>>, vector<1x128xbf16>
      %14 = arith.extf %13 : vector<1x128xbf16> to vector<1x128xf32>
      %15 = vector.broadcast %14 : vector<1x128xf32> to vector<2x128xf32>
      %16 = arith.addf %12, %15 : vector<2x128xf32>
      %17 = arith.negf %16 : vector<2x128xf32>
      %18 = math.exp %17 : vector<2x128xf32>
      %cst_14 = arith.constant 1.000000e+00 : f32
      %19 = vector.broadcast %cst_14 : f32 to vector<2x128xf32>
      %20 = arith.addf %19, %18 : vector<2x128xf32>
      %21 = arith.divf %19, %20 : vector<2x128xf32>
      %22 = arith.mulf %16, %21 : vector<2x128xf32>
      %23 = arith.truncf %22 : vector<2x128xf32> to vector<2x128xbf16>
      %c0_15 = arith.constant 0 : index
      %c0_16 = arith.constant 0 : index
      %24 = vector.load %arg6[%c0_15, %c0_16] : memref<2x128xbf16, #tpu.memory_space<vmem>>, vector<2x128xbf16>
      tpu.vector_store %arg6[%c0_15, %c0_16], %23 {strides = array<i32>} : memref<2x128xbf16, #tpu.memory_space<vmem>>, vector<2x128xbf16>,
    } else {
    }
    return
  }
  func.func @transform_0(%arg0: i32, %arg1: i32, %arg2: i32) -> (i32, i32) {
    %c0_i32 = arith.constant 0 : i32
    return %arg0, %arg2 : i32, i32
  }
  func.func @transform_1(%arg0: i32, %arg1: i32, %arg2: i32) -> (i32, i32) {
    %c0_i32 = arith.constant 0 : i32
    return %arg2, %arg1 : i32, i32
  }
  func.func @transform_2(%arg0: i32, %arg1: i32, %arg2: i32) -> (i32, i32) {
    %c0_i32 = arith.constant 0 : i32
    %c0_i32_0 = arith.constant 0 : i32
    return %c0_i32, %arg1 : i32, i32
  }
  func.func @transform_3(%arg0: i32, %arg1: i32, %arg2: i32) -> (i32, i32) {
    %c0_i32 = arith.constant 0 : i32
    return %arg0, %arg1 : i32, i32
  }
}

</mosaic_0001>

<bundles_post_ra>
// kernel: tpu_custom_call.1
= control target key start
LH: loop header
LB: loop body
LE: loop exit
PB: predicated region body
PF: predicated region fallthrough
CT: control target
= control target key end

     0   :  { %8 = vsyncpa [#allocation4], 0  ;;  %s280_s0 = inlined_call_operand.hbm [shape: bf16[2,32], index: 0, kind: input, shape index: {}]   ;;  %s281_s1 = inlined_call_operand.hbm [shape: bf16[32,128], index: 1, kind: input, shape index: {}]   ;;  %s282_s2 = inlined_call_operand.vmem [shape: bf16[1,128], index: 2, kind: input, shape index: {}]   ;;  %s283_s3 = inlined_call_operand.hbm [shape: bf16[2,128], index: 3, kind: output, shape index: {}]  }
   0x1   :  { %9 = vsyncpa [#allocation7], 0 }
   0x2   :  { %10 = vsyncpa [#allocation5], 0  ;;  %s241_s12 = smov [#allocation3]   ;;  %s242_s14 = smov [#allocation6]  }
   0x3   :  { %s17_s13 = sshll.u32 %s241_s12, 4  ;;  %s26_s15 = sshll.u32 %s242_s14, 4  ;;  %s18_s13 = int_to_ptr.vmem [resolvable:$true] %s17_s13  ;;  %s27_s15 = int_to_ptr.vmem [resolvable:$true] %s26_s15 }
   0x4   :  { %s183_s16 = scalar_lea.vmem %s18_s13, 16  ;;  %s187_s17 = scalar_lea.vmem %s18_s13, 32 }
   0x5   :  { %p184_p0 = scmp.ne.s32.totalorder %s18_s13, %s183_s16  ;;  %p188_p1 = scmp.lt.s32.totalorder %s18_s13, %s18_s13 }
   0x6   :  { %p189_p2 = scmp.lt.s32.totalorder %s187_s17, %s183_s16 }
   0x8   :  { %p190_p3 = por %p189_p2, %p188_p1 }
   0xa   :  { %p191_p4 = pnand %p190_p3, %p184_p0 }
   0xc   :  { %194 = shalt.err (!%p191_p4)
}
   0xd   :  { %20 = dma.hbm_to_vmem [thread:$0]  %s280_s0, 16, %s18_s13, [#allocation4]  }
   0xe   :  { %s203_s20 = scalar_lea.vmem %s27_s15, 256  ;;  %p208_p6 = scmp.lt.s32.totalorder %s27_s15, %s27_s15 }
   0xf   :  { %p204_p5 = scmp.ne.s32.totalorder %s27_s15, %s203_s20  ;;  %p209_p7 = scmp.lt.s32.totalorder %s203_s20, %s203_s20 }
  0x11   :  { %p210_p8 = por %p209_p7, %p208_p6 }
  0x13   :  { %p211_p9 = pnand %p210_p8, %p204_p5 }
  0x15   :  { %214 = shalt.err (!%p211_p9)
}
  0x16   :  { %s243_s21 = smov 64   ;;  %s244_s22 = smov 4  }
  0x17   :  { %32 = dma.hbm_to_vmem [thread:$0]  %s281_s1, 256, %s27_s15, [#allocation7], %s243_s21, %s243_s21, %s244_s22  }
  0x18   :  { %235 = dma.done.wait [#allocation4], 16  }
  0x19   :  { %236 = vsyncadd [#allocation4], 4294967280 }
  0x1a   :  { %237 = dma.done.wait [#allocation7], 256  }
  0x1b   :  { %238 = vsyncadd [#allocation7], 4294967040  ;;  %v245_v0 = vmov 0.0   ;;  %vm246_vm0 = vmmov 0   ;;  %v169_v1 = vld [vmem:[#allocation6 + $0x8] sm:$0xff]   ;;  %v170_v2 = vld [vmem:[#allocation6] sm:$0xff]   ;;  %v117_v4 = vlaneseq }
  0x1c   :  { %46 = vst [vmem:[#allocation2] sm:$0x3] %v245_v0  ;;  %154 = vmatprep.subr.bf16.mxu0 %v245_v0  ;;  %158 = vmatprep.mubr.msk.bf16.mxu0 %vm246_vm0, %v245_v0  ;;  %v47_v3 = vld [vmem:[#allocation3] sm:$0x1]  ;;  %vm65_vm1 = vcmask 261120   ;;  %s247_s25 = smov [#allocation8]  }
  0x1d   :  { %155 = vmatpush3.bf16.msra.mxu0 %v169_v1  ;;  %v118_v6 = vshrl.u32 %v117_v4, 7  ;;  %v115_v8 = vld [vmem:[%s282_s2] sm:$0x1]  ;;  %s137_s26 = sshll.u32 %s247_s25, 4  ;;  %s138_s26 = int_to_ptr.vmem [resolvable:$true] %s137_s26 }
  0x1e   :  { %156 = vmatprep.subr.bf16.mxu0 %v245_v0  ;;  %v116_v11 = vunpack.c.l.bf16 %v115_v8  ;;  %s215_s2 = scalar_lea.vmem %s138_s26, 16  ;;  %s219_s27 = scalar_lea.vmem %s138_s26, 32 }
  0x1f   :  { %v119_v12 = vsub.s32 0, %v118_v6  ;;  %p216_p10 = scmp.ne.s32.totalorder %s138_s26, %s215_s2  ;;  %p220_p11 = scmp.lt.s32.totalorder %s138_s26, %s138_s26 }
  0x20   :  { %p221_p12 = scmp.lt.s32.totalorder %s219_s27, %s215_s2 }
  0x21   :  { %157 = vmatpush3.bf16.msra.mxu0 %v170_v2  ;;  %v120_v15 = vrot.slane %v116_v11, %v119_v12 }
  0x22   :  { %p222_p13 = por %p221_p12, %p220_p11 }
  0x23   :  { %v48_v5 = vld [vmem:[#allocation2] sm:$0x3] }
  0x24   :  { %159 = vmatmul.mubr.msk.bf16.vlgmr.msra.gmra.mxu0 %vm65_vm1, %v47_v3  ;;  %p223_p0 = pnand %p222_p13, %p216_p10 }
  0xe4   :  { %v103_v7 = vpop.f32.mrf.mxu0 }
  0xe5   :  { %v109_v9 = vadd.f32 %v103_v7, %v48_v5 }
  0xe6   :  { %v160_v10 = vpop.f32.mrf.mxu0 }
  0xe7   :  { %110 = vst [vmem:[#allocation2] sm:$0x3] %v109_v9 }
  0xe8   :  { %v106_v13 = vpop.f32.mrf.mxu0 }
  0xea   :  { %v161_v14 = vpop.f32.mrf.mxu0 }
  0xee   :  { %v114_v16 = vld [vmem:[#allocation2] sm:$0x3] }
  0xef   :  { %v121_v17 = vadd.f32 %v120_v15, %v114_v16 }
  0xf1   :  { %v150_v18 = vmul.f32 -1.442695, %v121_v17 }
  0xf3   :  { %171 = vpow2.f32 %v150_v18 }
 0x100   :  { %v172_v19 = vpop.eup %171 }
 0x101   :  { %v125_v20 = vadd.f32 1.0, %v172_v19 }
 0x103   :  { %173 = vrcp.f32 %v125_v20 }
 0x110   :  { %v174_v21 = vpop.eup %173 }
 0x111   :  { %v128_v22 = vmul.f32 %v174_v21, %v121_v17 }
 0x113   :  { %v129_v23 = vpack.c.bf16 %v128_v22, %v128_v22 }
 0x115   :  { %130 = vst [vmem:[#allocation8] sm:$0x1] %v129_v23 }
 0x116   :  { %226 = shalt.err (!%p223_p0)
}
 0x117   :  { %140 = dma.vmem_to_hbm [thread:$0]  %s138_s26, 16, %s283_s3, [#allocation5]  }
 0x118   :  { %239 = dma.done.wait [#allocation5], 16  }
 0x119   :  { %240 = vsyncadd [#allocation5], 4294967280 }
 0x11a   :  { %144 = vsyncpa [#allocation4], 1 }
 0x11b   :  { %145 = vsyncpa [#allocation7], 1 }
 0x11c   :  { %146 = vsyncpa [#allocation5], 1 }

</bundles_post_ra>
